<compile_context>
chip_gen: v6e
topology: v6e:2x2x1
jax: 0.10.0
libtpu: 0.0.40
codegen_flags: <defaults>
</compile_context>

<pallas_src>
import functools

import jax
import jax.numpy as jnp
from jax import lax
from jax.experimental import pallas as pl
from jax.experimental.pallas import tpu as pltpu


def _dropout_kernel(seed_ref, x_ref, o_ref, *, threshold, inv_keep):
    """Inverted dropout on one (tile_rows, cols) tile using a stateless hash RNG."""
    rows, cols = x_ref.shape
    row_ids = lax.broadcasted_iota(jnp.int32, (rows, cols), 0)
    col_ids = lax.broadcasted_iota(jnp.int32, (rows, cols), 1)
    # Global element index of each entry in this tile (tiles only split rows).
    gid = (pl.program_id(0) * rows + row_ids) * cols + col_ids
    seed = seed_ref[0].astype(jnp.uint32)

    # Mix index with seed, then murmur3 fmix32 finalizer (~8 cheap VPU int ops/elem).
    h = gid.astype(jnp.uint32) + seed * jnp.uint32(0x9E3779B9) + jnp.uint32(0x632BE59B)
    h = h ^ (h >> 16)
    h = h * jnp.uint32(0x85EBCA6B)
    h = h ^ (h >> 13)
    h = h * jnp.uint32(0xC2B2AE35)
    h = h ^ (h >> 16)

    # keep an element iff h >= round(p * 2^32)  =>  P(keep) = 1 - p
    keep = h >= jnp.uint32(threshold)
    x = x_ref[...]
    scale = jnp.asarray(inv_keep, dtype=x_ref.dtype)   # stay in the input dtype
    o_ref[...] = jnp.where(keep, x * scale, jnp.zeros_like(x))


def fairseq_dropout(x, p, seed, *, training=True, apply_during_inference=False,
                    block_bytes=2 << 20):
    """JAX/Pallas equivalent of FairseqDropout.forward (functional; `inplace` ignored)."""
    p = float(p)
    if not (p > 0.0 and (training or apply_during_inference)):
        return x
    if p >= 1.0:
        return jnp.zeros_like(x)
    if x.size == 0:
        return x

    orig_shape = x.shape
    dtype = x.dtype
    itemsize = jnp.dtype(dtype).itemsize
    n = x.size

    # Lane-dense 2D view.  When n % 1024 == 0 this is a single layout-preserving
    # reshape (no extra HBM traffic); otherwise pad once and un-pad at the end.
    pad = (-n) % 1024
    if pad:
        # TODO(synk): rare fallback for sizes not divisible by 8*128; one pad + one slice.
        xf = jnp.pad(jnp.ravel(x), (0, pad))
    else:
        xf = jnp.ravel(x)
    total = n + pad

    cols = 128
    for c in (1024, 512, 256):                      # prefer the widest lane count
        if total % c == 0 and (total // c) % 8 == 0:
            cols = c
            break
    rows = total // cols
    x2 = xf.reshape(rows, cols)

    # Largest row tile (multiple of 8, divides rows) giving blocks of ~block_bytes.
    # 2 MiB blocks * 2 buffers * (in + out) = 8 MiB VMEM -> safe on v5e/v6e/v7x defaults.
    tr_cap = max(8, min(rows, ((block_bytes // (cols * itemsize)) // 8) * 8))
    tr = 8
    for t in range(8, tr_cap + 1, 8):
        if rows % t == 0:
            tr = t
    grid = (rows // tr,)

    seed_arr = jnp.asarray([seed], dtype=jnp.int32)
    threshold = min(int(round(p * 4294967296.0)), 4294967295)

    out2 = pl.pallas_call(
        functools.partial(_dropout_kernel, threshold=threshold,
                          inv_keep=1.0 / (1.0 - p)),
        out_shape=jax.ShapeDtypeStruct((rows, cols), dtype),
        grid=grid,
        in_specs=[
            pl.BlockSpec(memory_space=pltpu.MemorySpace.SMEM),   # scalar seed
            pl.BlockSpec((tr, cols), lambda i: (i, 0)),           # x tile
        ],
        out_specs=pl.BlockSpec((tr, cols), lambda i: (i, 0)),
        input_output_aliases={1: 0},                              # in-place dropout
        compiler_params=pltpu.CompilerParams(
            dimension_semantics=("parallel",)),                   # shard across v7x TCs
        cost_estimate=pl.CostEstimate(
            flops=16 * total, transcendentals=0,
            bytes_accessed=2 * total * itemsize),
    )(seed_arr, x2)

    if pad:
        return out2.reshape(-1)[:n].reshape(orig_shape)
    return out2.reshape(orig_shape)


if __name__ == "__main__":
    key = jax.random.PRNGKey(0)
    # NCHW-like activation tensor, as a graphormer activation would be.
    x = jax.random.normal(key, (2, 4, 16, 16), dtype=jnp.float32)
    p = 0.1

    # Training mode: dropout applied inside the Pallas kernel.
    y = fairseq_dropout(x, p, seed=0, training=True)
    y = jax.block_until_ready(y)

    # Semantics checks: every kept element equals x / (1 - p), dropped are 0.
    scaled = x / (1.0 - p)
    is_zero = jnp.isclose(y, 0.0)
    is_scaled = jnp.isclose(y, scaled, rtol=1e-5, atol=1e-6)
    assert bool(jnp.all(is_zero | is_scaled)), "dropout output mismatch"
    keep_frac = float(jnp.mean((~is_zero).astype(jnp.float32)))
    assert abs(keep_frac - (1.0 - p)) < 0.1, f"unexpected keep fraction {keep_frac}"

    # Eval mode (training=False, apply_during_inference=False): identity.
    y_eval = fairseq_dropout(x, p, seed=0, training=False)
    y_eval = jax.block_until_ready(y_eval)
    assert bool(jnp.all(y_eval == x)), "eval-mode dropout must be identity"

    print("KERNEL_OK")
</pallas_src>

<mosaic_0001>
module attributes {stable_mosaic.version = 11 : i64} {
  func.func @_dropout_kernel(%arg0: i32, %arg1: memref<1xi32, #tpu.memory_space<smem>>, %arg2: memref<8x256xf32, #tpu.memory_space<vmem>>, %arg3: memref<8x256xf32, #tpu.memory_space<vmem>>) attributes {dimension_semantics = [#tpu.dimension_semantics<parallel>], iteration_bounds = array<i64: 1>, scalar_prefetch = 0 : i64, scratch_operands = 0 : i64, tpu.core_type = #tpu.core_type<tc>, window_params = [{transform_indices = @transform_0, window_bounds = array<i64: 1>}, {transform_indices = @transform_1, window_bounds = array<i64: 8, 256>}, {transform_indices = @transform_2, window_bounds = array<i64: 8, 256>}]} {
    %0 = tpu.iota {dimensions = array<i32: 0>} : vector<8x256xi32>
    %1 = tpu.iota {dimensions = array<i32: 1>} : vector<8x256xi32>
    %c8_i32 = arith.constant 8 : i32
    %2 = arith.muli %arg0, %c8_i32 : i32
    %3 = vector.broadcast %2 : i32 to vector<8x256xi32>
    %4 = arith.addi %3, %0 : vector<8x256xi32>
    %c256_i32 = arith.constant 256 : i32
    %5 = vector.broadcast %c256_i32 : i32 to vector<8x256xi32>
    %6 = arith.muli %4, %5 : vector<8x256xi32>
    %7 = arith.addi %6, %1 : vector<8x256xi32>
    %c0 = arith.constant 0 : index
    %8 = memref.load %arg1[%c0] : memref<1xi32, #tpu.memory_space<smem>>
    %c-1640531527_i32 = arith.constant -1640531527 : i32
    %9 = arith.muli %8, %c-1640531527_i32 : i32
    %10 = vector.broadcast %9 : i32 to vector<8x256xi32>
    %11 = arith.addi %7, %10 : vector<8x256xi32>
    %c1663821211_i32 = arith.constant 1663821211 : i32
    %12 = vector.broadcast %c1663821211_i32 : i32 to vector<8x256xi32>
    %13 = arith.addi %11, %12 : vector<8x256xi32>
    %c16_i32 = arith.constant 16 : i32
    %14 = vector.broadcast %c16_i32 : i32 to vector<8x256xi32>
    %15 = arith.shrui %13, %14 : vector<8x256xi32>
    %16 = arith.xori %13, %15 : vector<8x256xi32>
    %c-2048144789_i32 = arith.constant -2048144789 : i32
    %17 = vector.broadcast %c-2048144789_i32 : i32 to vector<8x256xi32>
    %18 = arith.muli %16, %17 : vector<8x256xi32>
    %c13_i32 = arith.constant 13 : i32
    %19 = vector.broadcast %c13_i32 : i32 to vector<8x256xi32>
    %20 = arith.shrui %18, %19 : vector<8x256xi32>
    %21 = arith.xori %18, %20 : vector<8x256xi32>
    %c-1028477387_i32 = arith.constant -1028477387 : i32
    %22 = vector.broadcast %c-1028477387_i32 : i32 to vector<8x256xi32>
    %23 = arith.muli %21, %22 : vector<8x256xi32>
    %c16_i32_0 = arith.constant 16 : i32
    %24 = vector.broadcast %c16_i32_0 : i32 to vector<8x256xi32>
    %25 = arith.shrui %23, %24 : vector<8x256xi32>
    %26 = arith.xori %23, %25 : vector<8x256xi32>
    %c429496730_i32 = arith.constant 429496730 : i32
    %27 = vector.broadcast %c429496730_i32 : i32 to vector<8x256xi32>
    %28 = arith.cmpi uge, %26, %27 : vector<8x256xi32>
    %c0_1 = arith.constant 0 : index
    %c0_2 = arith.constant 0 : index
    %29 = vector.load %arg2[%c0_1, %c0_2] : memref<8x256xf32, #tpu.memory_space<vmem>>, vector<8x256xf32>
    %cst = arith.constant 1.11111116 : f32
    %30 = vector.broadcast %cst : f32 to vector<8x256xf32>
    %31 = arith.mulf %29, %30 : vector<8x256xf32>
    %cst_3 = arith.constant 0.000000e+00 : f32
    %32 = vector.broadcast %cst_3 : f32 to vector<8x256xf32>
    %33 = arith.select %28, %31, %32 : vector<8x256xi1>, vector<8x256xf32>
    %c0_4 = arith.constant 0 : index
    %c0_5 = arith.constant 0 : index
    %34 = vector.load %arg3[%c0_4, %c0_5] : memref<8x256xf32, #tpu.memory_space<vmem>>, vector<8x256xf32>
    tpu.vector_store %arg3[%c0_4, %c0_5], %33 {strides = array<i32>} : memref<8x256xf32, #tpu.memory_space<vmem>>, vector<8x256xf32>,
    return
  }
  func.func @transform_0(%arg0: i32) -> i32 {
    %c0_i32 = arith.constant 0 : i32
    %c0_i32_0 = arith.constant 0 : i32
    return %c0_i32 : i32
  }
  func.func @transform_1(%arg0: i32) -> (i32, i32) {
    %c0_i32 = arith.constant 0 : i32
    %c0_i32_0 = arith.constant 0 : i32
    return %arg0, %c0_i32 : i32, i32
  }
  func.func @transform_2(%arg0: i32) -> (i32, i32) {
    %c0_i32 = arith.constant 0 : i32
    %c0_i32_0 = arith.constant 0 : i32
    return %arg0, %c0_i32 : i32, i32
  }
}

</mosaic_0001>

<bundles_post_ra>
// kernel: tpu_custom_call.1
= control target key start
LH: loop header
LB: loop body
LE: loop exit
PB: predicated region body
PF: predicated region fallthrough
CT: control target
= control target key end

     0   :  { %8 = vsyncpa [#allocation4], 0  ;;  %s156_s0 = inlined_call_operand.<no memory space> [shape: s32[1], index: 0, kind: input, shape index: {}]   ;;  %s157_s1 = inlined_call_operand.hbm [shape: f32[8,256], index: 1, kind: input, shape index: {}, may-alias: {1,2}]   ;;  %s158_s2 = inlined_call_operand.hbm [shape: f32[8,256], index: 2, kind: output, shape index: {}, may-alias: {1,2}]  }
   0x1   :  { %9 = vsyncpa [#allocation5], 0  ;;  %s130_s9 = smov [#allocation3]  }
   0x2   :  { %s18_s10 = sshll.u32 %s130_s9, 4  ;;  %s19_s10 = int_to_ptr.vmem [resolvable:$true] %s18_s10 }
   0x3   :  { %s94_s11 = scalar_lea.vmem %s19_s10, 256  ;;  %p99_p1 = scmp.lt.s32.totalorder %s19_s10, %s19_s10 }
   0x4   :  { %p95_p0 = scmp.ne.s32.totalorder %s19_s10, %s94_s11  ;;  %p100_p2 = scmp.lt.s32.totalorder %s94_s11, %s94_s11 }
   0x6   :  { %p101_p3 = por %p100_p2, %p99_p1 }
   0x8   :  { %p102_p4 = pnand %p101_p3, %p95_p0 }
   0xa   :  { %105 = shalt.err (!%p102_p4)
}
   0xb   :  { %21 = dma.hbm_to_vmem [thread:$0]  %s157_s1, 256, %s19_s10, [#allocation4]  }
   0xc   :  { %126 = dma.done.wait [#allocation4], 256  }
   0xd   :  { %127 = vsyncadd [#allocation4], 4294967040  ;;  %v25_v0 = vlaneseq  ;;  %s37_s16 = smul.u32 2654435769, %s156_s0  ;;  %v61_v23 = vld [vmem:[#allocation3] sm:$0xff]  ;;  %v62_v25 = vld [vmem:[#allocation3 + $0x8] sm:$0xff] }
   0xe   :  { %v63_v28 = vmul.f32 1.1111112, %v61_v23  ;;  %v64_v29 = vmul.f32 1.1111112, %v62_v25  ;;  %s131_s0 = smov [#allocation6]  }
   0xf   :  { %v26_v1 = vshrl.u32 %v25_v0, 7  ;;  %v28_v2 = vand.u32 127, %v25_v0  ;;  %v38_v5 = vstv %s37_s16  ;;  %s75_s1 = sshll.u32 %s131_s0, 4  ;;  %s76_s1 = int_to_ptr.vmem [resolvable:$true] %s75_s1 }
  0x10   :  { %s106_s17 = scalar_lea.vmem %s76_s1, 256  ;;  %p111_p6 = scmp.lt.s32.totalorder %s76_s1, %s76_s1 }
  0x11   :  { %v33_v3 = vmul.u32 256, %v26_v1  ;;  %v29_v4 = vadd.s32 128, %v28_v2  ;;  %p107_p5 = scmp.ne.s32.totalorder %s76_s1, %s106_s17  ;;  %p112_p7 = scmp.lt.s32.totalorder %s106_s17, %s106_s17 }
  0x13   :  { %v34_v6 = vadd.s32 %v33_v3, %v28_v2  ;;  %v35_v7 = vadd.s32 %v33_v3, %v29_v4  ;;  %p113_p8 = por %p112_p7, %p111_p6 }
  0x15   :  { %v39_v8 = vadd.s32 %v38_v5, %v34_v6  ;;  %v40_v9 = vadd.s32 %v38_v5, %v35_v7  ;;  %p114_p9 = pnand %p113_p8, %p107_p5 }
  0x17   :  { %v41_v10 = vadd.s32 1663821211, %v39_v8  ;;  %v42_v11 = vadd.s32 1663821211, %v40_v9 }
  0x19   :  { %v43_v12 = vshrl.u32 %v41_v10, 16  ;;  %v44_v13 = vshrl.u32 %v42_v11, 16 }
  0x1b   :  { %v45_v14 = vxor.u32 %v43_v12, %v41_v10  ;;  %v46_v15 = vxor.u32 %v44_v13, %v42_v11 }
  0x1d   :  { %v47_v16 = vmul.u32 2246822507, %v45_v14  ;;  %v48_v17 = vmul.u32 2246822507, %v46_v15 }
  0x1f   :  { %v49_v18 = vshrl.u32 %v47_v16, 13  ;;  %v50_v19 = vshrl.u32 %v48_v17, 13 }
  0x21   :  { %v51_v20 = vxor.u32 %v49_v18, %v47_v16  ;;  %v52_v21 = vxor.u32 %v50_v19, %v48_v17 }
  0x23   :  { %v53_v22 = vmul.u32 3266489909, %v51_v20  ;;  %v54_v24 = vmul.u32 3266489909, %v52_v21 }
  0x25   :  { %v55_v26 = vshrl.u32 %v53_v22, 16  ;;  %v56_v27 = vshrl.u32 %v54_v24, 16 }
  0x27   :  { %v57_v30 = vxor.u32 %v55_v26, %v53_v22  ;;  %v58_v31 = vxor.u32 %v56_v27, %v54_v24 }
  0x29   :  { %vm59_vm0 = vcmp.ge.u32.totalorder %v57_v30, 429496730  ;;  %vm60_vm1 = vcmp.ge.u32.totalorder %v58_v31, 429496730 }
  0x2a   :  { %v65_v32 = vsel %vm59_vm0, %v63_v28, 0.0  ;;  %v66_v33 = vsel %vm60_vm1, %v64_v29, 0.0 }
  0x2b   :  { %67 = vst [vmem:[#allocation6] sm:$0xff] %v65_v32  ;;  %68 = vst [vmem:[#allocation6 + $0x8] sm:$0xff] %v66_v33 }
  0x2c   :  { %117 = shalt.err (!%p114_p9)
}
  0x2d   :  { %78 = dma.vmem_to_hbm [thread:$0]  %s76_s1, 256, %s158_s2, [#allocation5]  }
  0x2e   :  { %128 = dma.done.wait [#allocation5], 256  }
  0x2f   :  { %129 = vsyncadd [#allocation5], 4294967040 }
  0x30   :  { %82 = vsyncpa [#allocation4], 1 }
  0x31   :  { %83 = vsyncpa [#allocation5], 1 }

</bundles_post_ra>
